<compile_context>
chip_gen: v7x
topology: tpu7x:2x2x1
jax: 0.10.0
libtpu: 0.0.40
codegen_flags: <defaults>
</compile_context>

<pallas_src>
import functools

import jax
import jax.numpy as jnp
import numpy as np
from jax import lax
from jax.experimental import pallas as pl
from jax.experimental.pallas import tpu as pltpu

NEG_SLOPE = 0.01     # nn.LeakyReLU default
BN_EPS = 1e-5        # nn.BatchNorm2d default
LANE = 128
NCORES = 2           # shard the stats pass across 2 TCs on v7x; harmless on 1-TC chips
TILE_M_CAP = 8192    # upper bound on rows per tile


def _round_up(x, m):
    return (x + m - 1) // m * m


# Generation-aware VMEM budget (v7x: 64 MiB, v5e/v6e: 128 MiB).
try:
    _VMEM_CAP = int(pltpu.get_tpu_info().vmem_capacity_bytes)
except Exception:  # pragma: no cover - conservative fallback
    _VMEM_CAP = 64 * 1024 * 1024
_VMEM_LIMIT = min(int(_VMEM_CAP * 0.75), 100 * 1024 * 1024)
_TILE_BUDGET = int(_VMEM_LIMIT * 0.6)


def _choose_tile_m(M, K, Cpad):
    # Bytes per output row: double-buffered bf16 pr/pi input tiles (2*2*K*2),
    # double-buffered bf16 output tile (2*Cpad*2), ~3 live f32 temporaries (12*Cpad).
    per_row = 8 * K + 16 * Cpad
    tile = _TILE_BUDGET // max(per_row, 1)
    tile = max(16, min(TILE_M_CAP, tile))
    tile = min(tile, _round_up(M, 16))
    return _round_up(tile, 16)


# ---------------------------------------------------------------------------
# Pass 1: conv matmul per tile, accumulate per-core partial per-channel
#          sum / sum-of-squares directly into the output block.
# ---------------------------------------------------------------------------
def _stats_kernel(pr_ref, pi_ref, wt_ref, wb_ref, part_ref):
    t = pl.program_id(1)

    @pl.when(t == 0)
    def _():
        part_ref[...] = jnp.zeros_like(part_ref)

    conv = (jnp.dot(pr_ref[...], wt_ref[...], preferred_element_type=jnp.float32)
            + jnp.dot(pi_ref[...], wb_ref[...], preferred_element_type=jnp.float32))
    row_sum = jnp.sum(conv, axis=0, keepdims=True)
    row_sq = jnp.sum(conv * conv, axis=0, keepdims=True)
    part_ref[...] += jnp.concatenate([row_sum, row_sq], axis=0)


# ---------------------------------------------------------------------------
# Pass 2: recompute the (cheap) matmul per tile, apply fused BN scale/shift +
#          LeakyReLU, store in bf16 (lane-dense).
# ---------------------------------------------------------------------------
def _apply_kernel(pr_ref, pi_ref, wt_ref, wb_ref, ss_ref, out_ref):
    conv = (jnp.dot(pr_ref[...], wt_ref[...], preferred_element_type=jnp.float32)
            + jnp.dot(pi_ref[...], wb_ref[...], preferred_element_type=jnp.float32))
    v = conv * ss_ref[0:1, :] + ss_ref[1:2, :]
    out_ref[...] = jnp.where(v >= 0, v, NEG_SLOPE * v).astype(out_ref.dtype)


# ---------------------------------------------------------------------------
# Patch extraction (im2col) — fused by XLA; feature axis ordered (Cin, kh, kw).
# ---------------------------------------------------------------------------
def _patches(v, kh, kw, stride, pad):
    p = lax.conv_general_dilated_patches(
        v, (kh, kw), stride, [(pad[0], pad[0]), (pad[1], pad[1])],
        dimension_numbers=("NCHW", "OIHW", "NCHW"))        # (N, Cin*kh*kw, Ho, Wo)
    n, k, ho, wo = p.shape
    p = p.transpose(0, 2, 3, 1).reshape(n * ho * wo, k)    # (M, K)
    return p, ho, wo


@functools.partial(jax.jit, static_argnames=("filter_size", "stride_size", "padding"))
def encoder_forward(x, params, filter_size=(7, 5), stride_size=(2, 2),
                    padding=(0, 0)):
    kh, kw = filter_size

    xr = jnp.real(x).astype(jnp.float32)
    xi = jnp.imag(x).astype(jnp.float32)
    N, Cin, _, _ = xr.shape
    Cout = params["wr"].shape[0]
    K = Cin * kh * kw

    pr, Ho, Wo = _patches(xr, kh, kw, stride_size, padding)
    pi, _, _ = _patches(xi, kh, kw, stride_size, padding)
    M = N * Ho * Wo

    # Fused complex-conv weights: conv = pr @ [Wr|Wi] + pi @ [-Wi|Wr] -> [real|imag].
    wr = params["wr"].reshape(Cout, K).T.astype(jnp.float32)     # (K, Cout)
    wi = params["wi"].reshape(Cout, K).T.astype(jnp.float32)
    Cpad = max(LANE, _round_up(2 * Cout, LANE))                  # lane-dense channels

    def _padc(w):
        return jnp.pad(w, ((0, 0), (0, Cpad - 2 * Cout))).astype(jnp.bfloat16)

    w_top = _padc(jnp.concatenate([wr, wi], axis=1))             # (K, Cpad)
    w_bot = _padc(jnp.concatenate([-wi, wr], axis=1))            # (K, Cpad)

    tile_m = _choose_tile_m(M, K, Cpad)
    n_tiles = _round_up(pl.cdiv(M, tile_m), NCORES)
    tiles_per_core = n_tiles // NCORES
    M_pad = n_tiles * tile_m

    pr = jnp.pad(pr.astype(jnp.bfloat16), ((0, M_pad - M), (0, 0)))
    pi = jnp.pad(pi.astype(jnp.bfloat16), ((0, M_pad - M), (0, 0)))

    # ---- pass 1: per-core partial per-channel sum / sum-of-squares --------------
    part = pl.pallas_call(
        _stats_kernel,
        out_shape=jax.ShapeDtypeStruct((NCORES, 2, Cpad), jnp.float32),
        grid=(NCORES, tiles_per_core),
        in_specs=[
            pl.BlockSpec((tile_m, K), lambda c, t: (c * tiles_per_core + t, 0)),
            pl.BlockSpec((tile_m, K), lambda c, t: (c * tiles_per_core + t, 0)),
            pl.BlockSpec((K, Cpad), lambda c, t: (0, 0)),
            pl.BlockSpec((K, Cpad), lambda c, t: (0, 0)),
        ],
        out_specs=pl.BlockSpec((None, 2, Cpad), lambda c, t: (c, 0, 0)),
        compiler_params=pltpu.CompilerParams(
            dimension_semantics=("parallel", "arbitrary"),
            vmem_limit_bytes=_VMEM_LIMIT),
    )(pr, pi, w_top, w_bot)

    # Tiny BN finalize in plain JAX (one rsqrt per channel).
    gamma = jnp.concatenate([params["gamma_r"], params["gamma_i"]]).astype(jnp.float32)
    beta = jnp.concatenate([params["beta_r"], params["beta_i"]]).astype(jnp.float32)
    gamma = jnp.pad(gamma, (0, Cpad - 2 * Cout))
    beta = jnp.pad(beta, (0, Cpad - 2 * Cout))

    total_sum = jnp.sum(part[:, 0, :], axis=0)
    total_sq = jnp.sum(part[:, 1, :], axis=0)
    mean = total_sum / M                               # padded rows contribute zero
    var = total_sq / M - mean * mean                   # biased variance (training BN)
    scale = gamma * lax.rsqrt(var + BN_EPS)
    shift = beta - mean * scale
    # Conv biases (br, bi) are intentionally dropped: BN mean-subtraction cancels them.
    ss = jnp.stack([scale, shift])                     # (2, Cpad) f32

    # ---- pass 2: apply fused scale/shift + LeakyReLU, bf16 store -----------------
    out = pl.pallas_call(
        _apply_kernel,
        out_shape=jax.ShapeDtypeStruct((M_pad, Cpad), jnp.bfloat16),
        grid=(n_tiles,),
        in_specs=[
            pl.BlockSpec((tile_m, K), lambda i: (i, 0)),
            pl.BlockSpec((tile_m, K), lambda i: (i, 0)),
            pl.BlockSpec((K, Cpad), lambda i: (0, 0)),
            pl.BlockSpec((K, Cpad), lambda i: (0, 0)),
            pl.BlockSpec((2, Cpad), lambda i: (0, 0)),
        ],
        out_specs=pl.BlockSpec((tile_m, Cpad), lambda i: (i, 0)),
        compiler_params=pltpu.CompilerParams(
            dimension_semantics=("parallel",),
            vmem_limit_bytes=_VMEM_LIMIT),
    )(pr, pi, w_top, w_bot, ss)

    # Slice off lane/M padding, back to NCHW complex (model boundary only).
    out = out[:M].astype(jnp.float32)
    out_r = out[:, :Cout].reshape(N, Ho, Wo, Cout).transpose(0, 3, 1, 2)
    out_i = out[:, Cout:2 * Cout].reshape(N, Ho, Wo, Cout).transpose(0, 3, 1, 2)
    return lax.complex(out_r, out_i)


# ---------------------------------------------------------------------------
# Pure-JAX reference (sanity check against the Pallas kernels)
# ---------------------------------------------------------------------------
def encoder_reference(x, params, filter_size=(7, 5), stride_size=(2, 2),
                      padding=(0, 0)):
    xr = jnp.real(x).astype(jnp.float32)
    xi = jnp.imag(x).astype(jnp.float32)
    dn = ("NCHW", "OIHW", "NCHW")
    pad = [(padding[0], padding[0]), (padding[1], padding[1])]

    def conv(inp, w, b):
        out = lax.conv_general_dilated(inp, w, stride_size, pad,
                                       dimension_numbers=dn)
        return out + b[None, :, None, None]

    cr = conv(xr, params["wr"], params["br"]) - conv(xi, params["wi"], params["bi"])
    ci = conv(xr, params["wi"], params["bi"]) + conv(xi, params["wr"], params["br"])

    def bn_leaky(v, g, b):
        mean = jnp.mean(v, axis=(0, 2, 3), keepdims=True)
        var = jnp.mean(v * v, axis=(0, 2, 3), keepdims=True) - mean * mean
        vn = (v - mean) * lax.rsqrt(var + BN_EPS) * g[None, :, None, None] \
             + b[None, :, None, None]
        return jnp.where(vn >= 0, vn, NEG_SLOPE * vn)

    return lax.complex(bn_leaky(cr, params["gamma_r"], params["beta_r"]),
                       bn_leaky(ci, params["gamma_i"], params["beta_i"]))


def _make_params(key, cin, cout, kh, kw):
    ks = jax.random.split(key, 8)
    return dict(
        wr=0.1 * jax.random.normal(ks[0], (cout, cin, kh, kw), jnp.float32),
        wi=0.1 * jax.random.normal(ks[1], (cout, cin, kh, kw), jnp.float32),
        br=0.1 * jax.random.normal(ks[2], (cout,), jnp.float32),
        bi=0.1 * jax.random.normal(ks[3], (cout,), jnp.float32),
        gamma_r=1.0 + 0.1 * jax.random.normal(ks[4], (cout,), jnp.float32),
        beta_r=0.1 * jax.random.normal(ks[5], (cout,), jnp.float32),
        gamma_i=1.0 + 0.1 * jax.random.normal(ks[6], (cout,), jnp.float32),
        beta_i=0.1 * jax.random.normal(ks[7], (cout,), jnp.float32),
    )


def _check(key, N, Cin, H, W, Cout, filt, stride, pad):
    k0, k1, k2 = jax.random.split(key, 3)
    xr = jax.random.normal(k0, (N, Cin, H, W), jnp.float32)
    xi = jax.random.normal(k1, (N, Cin, H, W), jnp.float32)
    x = lax.complex(xr, xi)                       # complex64, NCHW (as in PyTorch)
    params = _make_params(k2, Cin, Cout, filt[0], filt[1])

    out = jax.block_until_ready(
        encoder_forward(x, params, filter_size=filt, stride_size=stride, padding=pad))

    Ho = (H + 2 * pad[0] - filt[0]) // stride[0] + 1
    Wo = (W + 2 * pad[1] - filt[1]) // stride[1] + 1
    assert out.shape == (N, Cout, Ho, Wo), out.shape
    assert out.dtype == jnp.complex64, out.dtype

    ref = encoder_reference(x, params, filter_size=filt, stride_size=stride, padding=pad)
    # bf16 MXU operands + bf16 output store -> slightly looser tolerance than pure-f32.
    np.testing.assert_allclose(np.asarray(out.real), np.asarray(ref.real),
                               rtol=3e-2, atol=2e-2)
    np.testing.assert_allclose(np.asarray(out.imag), np.asarray(ref.imag),
                               rtol=3e-2, atol=2e-2)


# ---------------------------------------------------------------------------
if __name__ == "__main__":
    key = jax.random.PRNGKey(0)
    k_a, k_b = jax.random.split(key)

    # Module defaults: in_channels=1, out_channels=45, filter (7,5), stride (2,2).
    _check(k_a, N=2, Cin=1, H=16, W=16, Cout=45, filt=(7, 5), stride=(2, 2), pad=(0, 0))

    # Extra Cin>1 case: validates the im2col (Cin, kh, kw) feature ordering
    # against the dense-conv reference (channel permutation would fail here).
    _check(k_b, N=2, Cin=3, H=12, W=12, Cout=8, filt=(3, 3), stride=(2, 2), pad=(0, 0))

    print("KERNEL_OK")
</pallas_src>

<mosaic_0001>
module attributes {stable_mosaic.version = 11 : i64} {
  func.func @_stats_kernel(%arg0: i32, %arg1: i32, %arg2: memref<64x35xbf16, #tpu.memory_space<vmem>>, %arg3: memref<64x35xbf16, #tpu.memory_space<vmem>>, %arg4: memref<35x128xbf16, #tpu.memory_space<vmem>>, %arg5: memref<35x128xbf16, #tpu.memory_space<vmem>>, %arg6: memref<1x2x128xf32, #tpu.memory_space<vmem>>) attributes {dimension_semantics = [#tpu.dimension_semantics<parallel>, #tpu.dimension_semantics<arbitrary>], iteration_bounds = array<i64: 2, 1>, scalar_prefetch = 0 : i64, scratch_operands = 0 : i64, tpu.core_type = #tpu.core_type<tc>, window_params = [{transform_indices = @transform_0, window_bounds = array<i64: 64, 35>}, {transform_indices = @transform_1, window_bounds = array<i64: 64, 35>}, {pipeline_mode = #tpu.pipeline_mode<synchronous>, transform_indices = @transform_2, window_bounds = array<i64: 35, 128>}, {pipeline_mode = #tpu.pipeline_mode<synchronous>, transform_indices = @transform_3, window_bounds = array<i64: 35, 128>}, {transform_indices = @transform_4, window_bounds = array<i64: 1, 2, 128>}]} {
    %c0_i32 = arith.constant 0 : i32
    %0 = arith.cmpi eq, %arg1, %c0_i32 : i32
    %1 = arith.extui %0 : i1 to i32
    %c0_i32_0 = arith.constant 0 : i32
    %2 = arith.cmpi ne, %1, %c0_i32_0 : i32
    scf.if %2 {
      %cst_17 = arith.constant 0.000000e+00 : f32
      %22 = vector.broadcast %cst_17 : f32 to vector<2x128xf32>
      %c0_18 = arith.constant 0 : index
      %c0_19 = arith.constant 0 : index
      %c0_20 = arith.constant 0 : index
      %23 = vector.load %arg6[%c0_18, %c0_19, %c0_20] : memref<1x2x128xf32, #tpu.memory_space<vmem>>, vector<1x2x128xf32>
      %24 = vector.shape_cast %23 : vector<1x2x128xf32> to vector<2x128xf32>
      %25 = vector.shape_cast %22 : vector<2x128xf32> to vector<1x2x128xf32>
      tpu.vector_store %arg6[%c0_18, %c0_19, %c0_20], %25 {strides = array<i32>} : memref<1x2x128xf32, #tpu.memory_space<vmem>>, vector<1x2x128xf32>,
    } else {
    }
    %c0 = arith.constant 0 : index
    %c0_1 = arith.constant 0 : index
    %3 = vector.load %arg2[%c0, %c0_1] : memref<64x35xbf16, #tpu.memory_space<vmem>>, vector<64x35xbf16>
    %c0_2 = arith.constant 0 : index
    %c0_3 = arith.constant 0 : index
    %4 = vector.load %arg4[%c0_2, %c0_3] : memref<35x128xbf16, #tpu.memory_space<vmem>>, vector<35x128xbf16>
    %cst = arith.constant dense<0.000000e+00> : vector<64x128xf32>
    %5 = tpu.matmul %3, %4, %cst {dimension_numbers = #tpu.dot_dimension_numbers<[1], [0], [0], [1], [0, 0, 1, 1], [], []>} : vector<64x35xbf16>, vector<35x128xbf16>, vector<64x128xf32> -> vector<64x128xf32>
    %c0_4 = arith.constant 0 : index
    %c0_5 = arith.constant 0 : index
    %6 = vector.load %arg3[%c0_4, %c0_5] : memref<64x35xbf16, #tpu.memory_space<vmem>>, vector<64x35xbf16>
    %c0_6 = arith.constant 0 : index
    %c0_7 = arith.constant 0 : index
    %7 = vector.load %arg5[%c0_6, %c0_7] : memref<35x128xbf16, #tpu.memory_space<vmem>>, vector<35x128xbf16>
    %cst_8 = arith.constant dense<0.000000e+00> : vector<64x128xf32>
    %8 = tpu.matmul %6, %7, %cst_8 {dimension_numbers = #tpu.dot_dimension_numbers<[1], [0], [0], [1], [0, 0, 1, 1], [], []>} : vector<64x35xbf16>, vector<35x128xbf16>, vector<64x128xf32> -> vector<64x128xf32>
    %9 = arith.addf %5, %8 : vector<64x128xf32>
    %cst_9 = arith.constant dense<0.000000e+00> : vector<128xf32>
    %10 = vector.multi_reduction <add>, %9, %cst_9 [0] : vector<64x128xf32> to vector<128xf32>
    %11 = vector.shape_cast %10 : vector<128xf32> to vector<1x128xf32>
    %12 = arith.mulf %9, %9 : vector<64x128xf32>
    %cst_10 = arith.constant dense<0.000000e+00> : vector<128xf32>
    %13 = vector.multi_reduction <add>, %12, %cst_10 [0] : vector<64x128xf32> to vector<128xf32>
    %14 = vector.shape_cast %13 : vector<128xf32> to vector<1x128xf32>
    %c0_11 = arith.constant 0 : index
    %c0_12 = arith.constant 0 : index
    %c0_13 = arith.constant 0 : index
    %15 = vector.load %arg6[%c0_11, %c0_12, %c0_13] : memref<1x2x128xf32, #tpu.memory_space<vmem>>, vector<1x2x128xf32>
    %16 = vector.shape_cast %15 : vector<1x2x128xf32> to vector<2x128xf32>
    %17 = tpu.concatenate %11, %14 in 0 : vector<1x128xf32>, vector<1x128xf32> -> vector<2x128xf32>
    %18 = arith.addf %16, %17 : vector<2x128xf32>
    %c0_14 = arith.constant 0 : index
    %c0_15 = arith.constant 0 : index
    %c0_16 = arith.constant 0 : index
    %19 = vector.load %arg6[%c0_14, %c0_15, %c0_16] : memref<1x2x128xf32, #tpu.memory_space<vmem>>, vector<1x2x128xf32>
    %20 = vector.shape_cast %19 : vector<1x2x128xf32> to vector<2x128xf32>
    %21 = vector.shape_cast %18 : vector<2x128xf32> to vector<1x2x128xf32>
    tpu.vector_store %arg6[%c0_14, %c0_15, %c0_16], %21 {strides = array<i32>} : memref<1x2x128xf32, #tpu.memory_space<vmem>>, vector<1x2x128xf32>,
    return
  }
  func.func @transform_0(%arg0: i32, %arg1: i32) -> (i32, i32) {
    %c1_i32 = arith.constant 1 : i32
    %0 = arith.muli %arg0, %c1_i32 : i32
    %1 = arith.addi %0, %arg1 : i32
    %c0_i32 = arith.constant 0 : i32
    %c0_i32_0 = arith.constant 0 : i32
    return %1, %c0_i32 : i32, i32
  }
  func.func @transform_1(%arg0: i32, %arg1: i32) -> (i32, i32) {
    %c1_i32 = arith.constant 1 : i32
    %0 = arith.muli %arg0, %c1_i32 : i32
    %1 = arith.addi %0, %arg1 : i32
    %c0_i32 = arith.constant 0 : i32
    %c0_i32_0 = arith.constant 0 : i32
    return %1, %c0_i32 : i32, i32
  }
  func.func @transform_2(%arg0: i32, %arg1: i32) -> (i32, i32) {
    %c0_i32 = arith.constant 0 : i32
    %c0_i32_0 = arith.constant 0 : i32
    %c0_i32_1 = arith.constant 0 : i32
    return %c0_i32, %c0_i32_0 : i32, i32
  }
  func.func @transform_3(%arg0: i32, %arg1: i32) -> (i32, i32) {
    %c0_i32 = arith.constant 0 : i32
    %c0_i32_0 = arith.constant 0 : i32
    %c0_i32_1 = arith.constant 0 : i32
    return %c0_i32, %c0_i32_0 : i32, i32
  }
  func.func @transform_4(%arg0: i32, %arg1: i32) -> (i32, i32, i32) {
    %c0_i32 = arith.constant 0 : i32
    %c0_i32_0 = arith.constant 0 : i32
    %c0_i32_1 = arith.constant 0 : i32
    return %arg0, %c0_i32, %c0_i32_0 : i32, i32, i32
  }
}

module attributes {stable_mosaic.version = 11 : i64} {
  func.func @_apply_kernel(%arg0: i32, %arg1: memref<64x35xbf16, #tpu.memory_space<vmem>>, %arg2: memref<64x35xbf16, #tpu.memory_space<vmem>>, %arg3: memref<35x128xbf16, #tpu.memory_space<vmem>>, %arg4: memref<35x128xbf16, #tpu.memory_space<vmem>>, %arg5: memref<2x128xf32, #tpu.memory_space<vmem>>, %arg6: memref<64x128xbf16, #tpu.memory_space<vmem>>) attributes {dimension_semantics = [#tpu.dimension_semantics<parallel>], iteration_bounds = array<i64: 2>, scalar_prefetch = 0 : i64, scratch_operands = 0 : i64, tpu.core_type = #tpu.core_type<tc>, window_params = [{transform_indices = @transform_0, window_bounds = array<i64: 64, 35>}, {transform_indices = @transform_1, window_bounds = array<i64: 64, 35>}, {pipeline_mode = #tpu.pipeline_mode<synchronous>, transform_indices = @transform_2, window_bounds = array<i64: 35, 128>}, {pipeline_mode = #tpu.pipeline_mode<synchronous>, transform_indices = @transform_3, window_bounds = array<i64: 35, 128>}, {pipeline_mode = #tpu.pipeline_mode<synchronous>, transform_indices = @transform_4, window_bounds = array<i64: 2, 128>}, {transform_indices = @transform_5, window_bounds = array<i64: 64, 128>}]} {
    %c0 = arith.constant 0 : index
    %c0_0 = arith.constant 0 : index
    %0 = vector.load %arg1[%c0, %c0_0] : memref<64x35xbf16, #tpu.memory_space<vmem>>, vector<64x35xbf16>
    %c0_1 = arith.constant 0 : index
    %c0_2 = arith.constant 0 : index
    %1 = vector.load %arg3[%c0_1, %c0_2] : memref<35x128xbf16, #tpu.memory_space<vmem>>, vector<35x128xbf16>
    %cst = arith.constant dense<0.000000e+00> : vector<64x128xf32>
    %2 = tpu.matmul %0, %1, %cst {dimension_numbers = #tpu.dot_dimension_numbers<[1], [0], [0], [1], [0, 0, 1, 1], [], []>} : vector<64x35xbf16>, vector<35x128xbf16>, vector<64x128xf32> -> vector<64x128xf32>
    %c0_3 = arith.constant 0 : index
    %c0_4 = arith.constant 0 : index
    %3 = vector.load %arg2[%c0_3, %c0_4] : memref<64x35xbf16, #tpu.memory_space<vmem>>, vector<64x35xbf16>
    %c0_5 = arith.constant 0 : index
    %c0_6 = arith.constant 0 : index
    %4 = vector.load %arg4[%c0_5, %c0_6] : memref<35x128xbf16, #tpu.memory_space<vmem>>, vector<35x128xbf16>
    %cst_7 = arith.constant dense<0.000000e+00> : vector<64x128xf32>
    %5 = tpu.matmul %3, %4, %cst_7 {dimension_numbers = #tpu.dot_dimension_numbers<[1], [0], [0], [1], [0, 0, 1, 1], [], []>} : vector<64x35xbf16>, vector<35x128xbf16>, vector<64x128xf32> -> vector<64x128xf32>
    %6 = arith.addf %2, %5 : vector<64x128xf32>
    %c0_8 = arith.constant 0 : index
    %c0_9 = arith.constant 0 : index
    %7 = vector.load %arg5[%c0_8, %c0_9] : memref<2x128xf32, #tpu.memory_space<vmem>>, vector<1x128xf32>
    %8 = vector.broadcast %7 : vector<1x128xf32> to vector<64x128xf32>
    %9 = arith.mulf %6, %8 : vector<64x128xf32>
    %c1 = arith.constant 1 : index
    %c0_10 = arith.constant 0 : index
    %10 = vector.load %arg5[%c1, %c0_10] : memref<2x128xf32, #tpu.memory_space<vmem>>, vector<1x128xf32>
    %11 = vector.broadcast %10 : vector<1x128xf32> to vector<64x128xf32>
    %12 = arith.addf %9, %11 : vector<64x128xf32>
    %cst_11 = arith.constant 0.000000e+00 : f32
    %13 = vector.broadcast %cst_11 : f32 to vector<64x128xf32>
    %14 = arith.cmpf oge, %12, %13 : vector<64x128xf32>
    %cst_12 = arith.constant 0.00999999977 : f32
    %15 = vector.broadcast %cst_12 : f32 to vector<64x128xf32>
    %16 = arith.mulf %15, %12 : vector<64x128xf32>
    %17 = arith.select %14, %12, %16 : vector<64x128xi1>, vector<64x128xf32>
    %18 = arith.truncf %17 : vector<64x128xf32> to vector<64x128xbf16>
    %c0_13 = arith.constant 0 : index
    %c0_14 = arith.constant 0 : index
    %19 = vector.load %arg6[%c0_13, %c0_14] : memref<64x128xbf16, #tpu.memory_space<vmem>>, vector<64x128xbf16>
    tpu.vector_store %arg6[%c0_13, %c0_14], %18 {strides = array<i32>} : memref<64x128xbf16, #tpu.memory_space<vmem>>, vector<64x128xbf16>,
    return
  }
  func.func @transform_0(%arg0: i32) -> (i32, i32) {
    %c0_i32 = arith.constant 0 : i32
    %c0_i32_0 = arith.constant 0 : i32
    return %arg0, %c0_i32 : i32, i32
  }
  func.func @transform_1(%arg0: i32) -> (i32, i32) {
    %c0_i32 = arith.constant 0 : i32
    %c0_i32_0 = arith.constant 0 : i32
    return %arg0, %c0_i32 : i32, i32
  }
  func.func @transform_2(%arg0: i32) -> (i32, i32) {
    %c0_i32 = arith.constant 0 : i32
    %c0_i32_0 = arith.constant 0 : i32
    %c0_i32_1 = arith.constant 0 : i32
    return %c0_i32, %c0_i32_0 : i32, i32
  }
  func.func @transform_3(%arg0: i32) -> (i32, i32) {
    %c0_i32 = arith.constant 0 : i32
    %c0_i32_0 = arith.constant 0 : i32
    %c0_i32_1 = arith.constant 0 : i32
    return %c0_i32, %c0_i32_0 : i32, i32
  }
  func.func @transform_4(%arg0: i32) -> (i32, i32) {
    %c0_i32 = arith.constant 0 : i32
    %c0_i32_0 = arith.constant 0 : i32
    %c0_i32_1 = arith.constant 0 : i32
    return %c0_i32, %c0_i32_0 : i32, i32
  }
  func.func @transform_5(%arg0: i32) -> (i32, i32) {
    %c0_i32 = arith.constant 0 : i32
    %c0_i32_0 = arith.constant 0 : i32
    return %arg0, %c0_i32 : i32, i32
  }
}

</mosaic_0001>

<bundles_post_ra>
// kernel: custom-call
= control target key start
LH: loop header
LB: loop body
LE: loop exit
PB: predicated region body
PF: predicated region fallthrough
CT: control target
= control target key end

     0   :  { %2 = vsyncpa [#allocation0], 0  ;;  %s61_s0 = inlined_call_operand.hbm [shape: c64[2,1,16,16], index: 0, kind: input, shape index: {}]   ;;  %s62_s1 = inlined_call_operand.vmem [shape: f32[2,1,16,16], index: 1, kind: output, shape index: {}]  }
   0x1   :  { %s3_s8 = sshll.u32 %s62_s1, 4  ;;  %s9_s11 = scalar_lea.hbm %s61_s0, 512  ;;  %s4_s8 = int_to_ptr.vmem [resolvable:$true] %s3_s8 }
   0x2   :  { %p10_p0 = scmp.ne.s32.totalorder %s61_s0, %s9_s11  ;;  %s11_s16 = scalar_lea.hbm %s61_s0, 1024 }
   0x3   :  { %p12_p1 = scmp.lt.u32.totalorder %s11_s16, %s9_s11  ;;  %p13_p2 = scmp.lt.u32.totalorder %s9_s11, %s61_s0 }
   0x5   :  { %p14_p3 = por %p13_p2, %p12_p1 }
   0x7   :  { %p15_p4 = pnand %p14_p3, %p10_p0 }
   0x9   :  { %18 = shalt.err (!%p15_p4)  }
   0xa   :  { %s19_s1 = scalar_lea.vmem %s4_s8, 512  ;;  %p24_p6 = scmp.lt.s32.totalorder %s4_s8, %s4_s8 }
   0xb   :  { %p20_p5 = scmp.ne.s32.totalorder %s4_s8, %s19_s1  ;;  %p25_p7 = scmp.lt.s32.totalorder %s19_s1, %s19_s1 }
   0xd   :  { %p26_p8 = por %p25_p7, %p24_p6 }
   0xf   :  { %p27_p9 = pnand %p26_p8, %p20_p5 }
  0x11   :  { %30 = shalt.err (!%p27_p9)  }
  0x12   :  { %6 = dma.hbm_to_vmem [thread:$0]  %s61_s0, 512, %s4_s8, [#allocation0] }
  0x13   :  { %31 = dma.done.wait [#allocation0], 512  }
  0x14   :  { %32 = vsyncadd [#allocation0], 4294966784 }
  0x15   :  { %8 = vsyncpa [#allocation0], 1 }

// kernel: custom-call.1
= control target key start
LH: loop header
LB: loop body
LE: loop exit
PB: predicated region body
PF: predicated region fallthrough
CT: control target
= control target key end

     0   :  { %s59_s0 = inlined_call_operand.hbm [shape: c64[2,1,16,16], index: 0, kind: input, shape index: {}]   ;;  %s60_s1 = inlined_call_operand.vmem [shape: f32[2,1,16,16], index: 1, kind: output, shape index: {}]  }
   0x1   :  { %s2_s8 = scalar_lea.hbm %s59_s0, 512 }
   0x2   :  { %3 = vsyncpa [#allocation0], 0  ;;  %s4_s11 = sshll.u32 %s60_s1, 4  ;;  %s34_s14 = scalar_lea.hbm %s59_s0, 1024  ;;  %s5_s11 = int_to_ptr.vmem [resolvable:$true] %s4_s11 }
   0x3   :  { %p11_p0 = scmp.ne.s32.totalorder %s2_s8, %s34_s14  ;;  %p13_p1 = scmp.lt.u32.totalorder %s2_s8, %s59_s0 }
   0x4   :  { %p14_p2 = scmp.lt.u32.totalorder %s34_s14, %s34_s14  ;;  %p16_p4 = scmp.lt.u32.totalorder %s34_s14, %s2_s8 }
   0x6   :  { %p15_p3 = por %p14_p2, %p13_p1 }
   0x8   :  { %p17_p5 = por %p16_p4, %p15_p3 }
   0xa   :  { %p18_p6 = pnand %p17_p5, %p11_p0 }
   0xc   :  { %21 = shalt.err (!%p18_p6)  }
   0xd   :  { %s22_s17 = scalar_lea.vmem %s5_s11, 512  ;;  %p27_p8 = scmp.lt.s32.totalorder %s5_s11, %s5_s11 }
   0xe   :  { %p23_p7 = scmp.ne.s32.totalorder %s5_s11, %s22_s17  ;;  %p28_p9 = scmp.lt.s32.totalorder %s22_s17, %s22_s17 }
  0x10   :  { %p29_p10 = por %p28_p9, %p27_p8 }
  0x12   :  { %p30_p11 = pnand %p29_p10, %p23_p7 }
  0x14   :  { %33 = shalt.err (!%p30_p11)  }
  0x15   :  { %7 = dma.hbm_to_vmem [thread:$0]  %s2_s8, 512, %s5_s11, [#allocation0] }
  0x16   :  { %35 = dma.done.wait [#allocation0], 512  }
  0x17   :  { %36 = vsyncadd [#allocation0], 4294966784 }
  0x18   :  { %9 = vsyncpa [#allocation0], 1 }

// kernel: custom-call.2
= control target key start
LH: loop header
LB: loop body
LE: loop exit
PB: predicated region body
PF: predicated region fallthrough
CT: control target
= control target key end

     0   :  { %s262_s0 = inlined_call_operand.vmem [shape: f32[2,45,5,6], index: 0, kind: input, shape index: {}]   ;;  %s263_s2 = inlined_call_operand.vmem [shape: c64[2,45,5,6], index: 2, kind: output, shape index: {}]   ;;  %s264_s1 = inlined_call_operand.vmem [shape: f32[2,45,5,6], index: 1, kind: input, shape index: {}]  }
   0x1   :  { %v5_v0 = vld [vmem:[%s262_s0] sm:$0xff]  ;;  %v90_v1 = vld [vmem:[%s262_s0 + $0x8] sm:$0xff]  ;;  %v92_v2 = vld [vmem:[%s262_s0 + $0x10] sm:$0xff] }
   0x2   :  { %6 = vst [vmem:[%s263_s2] sm:$0xff] %v5_v0  ;;  %91 = vst [vmem:[%s263_s2 + $0x8] sm:$0xff] %v90_v1  ;;  %v94_v3 = vld [vmem:[%s262_s0 + $0x18] sm:$0xff]  ;;  %v96_v4 = vld [vmem:[%s262_s0 + $0x20] sm:$0xff] }
   0x3   :  { %93 = vst [vmem:[%s263_s2 + $0x10] sm:$0xff] %v92_v2  ;;  %v98_v5 = vld [vmem:[%s262_s0 + $0x28] sm:$0xff]  ;;  %95 = vst [vmem:[%s263_s2 + $0x18] sm:$0xff] %v94_v3  ;;  %v100_v6 = vld [vmem:[%s262_s0 + $0x30] sm:$0xff] }
   0x4   :  { %97 = vst [vmem:[%s263_s2 + $0x20] sm:$0xff] %v96_v4  ;;  %99 = vst [vmem:[%s263_s2 + $0x28] sm:$0xff] %v98_v5  ;;  %v102_v7 = vld [vmem:[%s262_s0 + $0x38] sm:$0xff]  ;;  %v104_v8 = vld [vmem:[%s262_s0 + $0x40] sm:$0xff] }
   0x5   :  { %101 = vst [vmem:[%s263_s2 + $0x30] sm:$0xff] %v100_v6  ;;  %103 = vst [vmem:[%s263_s2 + $0x38] sm:$0xff] %v102_v7  ;;  %v106_v9 = vld [vmem:[%s262_s0 + $0x48] sm:$0xff]  ;;  %v43_v10 = vld [vmem:[%s264_s1] sm:$0xff] }
   0x6   :  { %105 = vst [vmem:[%s263_s2 + $0x40] sm:$0xff] %v104_v8  ;;  %v109_v11 = vld [vmem:[%s264_s1 + $0x8] sm:$0xff]  ;;  %107 = vst [vmem:[%s263_s2 + $0x48] sm:$0xff] %v106_v9  ;;  %v111_v12 = vld [vmem:[%s264_s1 + $0x10] sm:$0xff] }
   0x7   :  { %108 = vst [vmem:[%s263_s2 + $0x50] sm:$0xff] %v43_v10  ;;  %110 = vst [vmem:[%s263_s2 + $0x58] sm:$0xff] %v109_v11  ;;  %v113_v13 = vld [vmem:[%s264_s1 + $0x18] sm:$0xff]  ;;  %v115_v14 = vld [vmem:[%s264_s1 + $0x20] sm:$0xff] }
   0x8   :  { %112 = vst [vmem:[%s263_s2 + $0x60] sm:$0xff] %v111_v12  ;;  %114 = vst [vmem:[%s263_s2 + $0x68] sm:$0xff] %v113_v13  ;;  %v117_v15 = vld [vmem:[%s264_s1 + $0x28] sm:$0xff]  ;;  %v119_v16 = vld [vmem:[%s264_s1 + $0x30] sm:$0xff] }
   0x9   :  { %116 = vst [vmem:[%s263_s2 + $0x70] sm:$0xff] %v115_v14  ;;  %v121_v17 = vld [vmem:[%s264_s1 + $0x38] sm:$0xff]  ;;  %118 = vst [vmem:[%s263_s2 + $0x78] sm:$0xff] %v117_v15  ;;  %v123_v18 = vld [vmem:[%s264_s1 + $0x40] sm:$0xff] }
   0xa   :  { %120 = vst [vmem:[%s263_s2 + $0x80] sm:$0xff] %v119_v16  ;;  %122 = vst [vmem:[%s263_s2 + $0x88] sm:$0xff] %v121_v17  ;;  %v125_v19 = vld [vmem:[%s264_s1 + $0x48] sm:$0xff] }
   0xb   :  { %124 = vst [vmem:[%s263_s2 + $0x90] sm:$0xff] %v123_v18  ;;  %126 = vst [vmem:[%s263_s2 + $0x98] sm:$0xff] %v125_v19 }

// kernel: encoder_forward.2
= control target key start
LH: loop header
LB: loop body
LE: loop exit
PB: predicated region body
PF: predicated region fallthrough
CT: control target
= control target key end

     0   :  { %s799_s15 = smov 0   ;;  %s801_s16 = smov 0   ;;  %s873_s0 = inlined_call_operand.vmem [shape: bf16[128,35], index: 0, kind: input, shape index: {}]   ;;  %s874_s1 = inlined_call_operand.vmem [shape: bf16[128,35], index: 1, kind: input, shape index: {}]   ;;  %s875_s2 = inlined_call_operand.vmem [shape: bf16[35,128], index: 2, kind: input, shape index: {}]   ;;  %s876_s3 = inlined_call_operand.vmem [shape: bf16[35,128], index: 3, kind: input, shape index: {}]   ;;  %s877_s4 = inlined_call_operand.vmem [shape: f32[2,2,128], index: 4, kind: output, shape index: {}]  }
   0x1   :  { %s803_s17 = smov 0  }
   0x2 LB: > { %s26_s18 = sadd.s32 1, %s766_s16  ;;  %p628_p0 = scmp.ge.s32.totalorder %s770_s17, 1  ;;  %s770_s17 = sphi %s803_s17, %s14_s17   ;;  %s766_s16 = sphi %s801_s16, %s879_s16   ;;  %s762_s15 = sphi %s799_s15, %s878_s15  }
   0x3   : > { %p28_p1 = scmp.ge.s32.totalorder %s26_s18, 2  ;;  %p194_p2 = scmp.lt.s32.totalorder %s770_s17, 3 }
   0x5   : > { %s881_s18 = smov (%p28_p1, %s26_s18), 0  ;;  %p195_p3 = pnand %p628_p0, %p194_p2 }
   0x6   : > { %v734_v0 = vld [vmem:[%s876_s3] sm:$0xff] (!%p195_p3)   ;;  %vm326_vm0 = vcmask (!%p195_p3), 1040384   ;;  %vm327_vm1 = vcmask (!%p195_p3), 1041408   ;;  %v736_v2 = vld [vmem:[%s876_s3 + $0x8] sm:$0xff] (!%p195_p3)   ;;  %v772_v4 = vmov (!%p195_p3), 65535   ;;  %s629_s5 = sshll.u32 (!%p195_p3), %s762_s15, 3 }
   0x7   : > { %198 = sbr.rel (%p195_p3) target bundleno = 269 (0x10d), region = 36  ;;  %v735_v1 = vld [vmem:[%s875_s2] sm:$0xff] (!%p195_p3)   ;;  %672 = vmatprep.subr.bf16.mxu1 (!%p195_p3), %v734_v0  ;;  %v737_v3 = vld [vmem:[%s875_s2 + $0x8] sm:$0xff] (!%p195_p3)   ;;  %v328_v5 = vsel (!%p195_p3), %vm326_vm0, 4294967295, %v772_v4  ;;  %p228_p4 = scmp.lt.s32.totalorder (!%p195_p3), %s629_s5, 15  ;;  %vm313_vm2 = vcmask (!%p195_p3), 285696  }
   0x8   : > { %686 = vmatprep.subr.bf16.mxu0 (!%p195_p3), %v735_v1  ;;  %673 = vmatpush3.bf16.msra.mxu1 (!%p195_p3), %v734_v0  ;;  %v738_v6 = vld [vmem:[%s876_s3 + $0x10] ss:$0 sps:$4 sm:$0x33] (!%p195_p3)   ;;  %v329_v7 = vsel (!%p195_p3), %vm327_vm1, %v328_v5, 0  ;;  %p242_p5 = scmp.lt.s32.totalorder (!%p195_p3), %s762_s15, 1  ;;  %v773_v19 = vmov (!%p195_p3), 0.0  }
   0x9   : > { %687 = vmatpush3.bf16.msra.mxu0 (!%p195_p3), %v735_v1  ;;  %674 = vmatprep.subr.bf16.mxu1 (!%p195_p3), %v736_v2  ;;  %v739_v8 = vld [vmem:[%s875_s2 + $0x10] ss:$0 sps:$4 sm:$0x33] (!%p195_p3)   ;;  %v331_v9 = vand.u32 (!%p195_p3), %v738_v6, %v329_v7 }
   0xa   : > { %688 = vmatprep.subr.bf16.mxu0 (!%p195_p3), %v737_v3  ;;  %v446_v10 = vand.u32 (!%p195_p3), %v739_v8, %v329_v7 }
   0xc   : > { %675 = vmatpush3.bf16.msra.mxu1 (!%p195_p3), %v736_v2 }
   0xd   : > { %689 = vmatpush3.bf16.msra.mxu0 (!%p195_p3), %v737_v3  ;;  %676 = vmatprep.subr.bf16.mxu1 (!%p195_p3), %v331_v9 }
   0xe   : > { %s883_s5 = smov (!%p228_p4, %s629_s5), 15  ;;  %690 = vmatprep.subr.bf16.mxu0 %v446_v10  ;;  %s885_s15 = smov (!%p242_p5, %s762_s15), 1 }
   0xf   : > { %s630_s6 = sshll.u32 %s883_s5, 2  ;;  %s633_s13 = sshll.u32 %s885_s15, 1 }
  0x10   : > { %677 = vmatpush3.bf16.msra.mxu1 %v331_v9  ;;  %s239_s9 = scalar_lea.vmem %s874_s1, %s630_s6  ;;  %s231_s12 = scalar_lea.vmem %s873_s0, %s630_s6 }
  0x11   : > { %691 = vmatpush3.bf16.msra.mxu0 %v446_v10  ;;  %v740_v11 = vld [vmem:[%s239_s9] sm:$0xff]   ;;  %v742_v13 = vld [vmem:[%s239_s9 + $0x8] sm:$0xff]   ;;  %v744_v15 = vld [vmem:[%s239_s9 + $0x10] sm:$0xff]   ;;  %s858_s20 = scalar_lea.vmem %s877_s4, %s633_s13 }
  0x12   : > { %v741_v12 = vld [vmem:[%s231_s12] sm:$0xff]   ;;  %678 = vmatprep.mubr.msk.bf16.mxu1 %vm313_vm2, %v740_v11  ;;  %v743_v14 = vld [vmem:[%s231_s12 + $0x8] sm:$0xff]   ;;  %v745_v16 = vld [vmem:[%s231_s12 + $0x10] sm:$0xff]   ;;  %251 = vst [vmem:[%s858_s20] sm:$0x3] %v773_v19 }
  0x13   : > { %692 = vmatprep.mubr.msk.bf16.mxu0 %vm313_vm2, %v741_v12  ;;  %679 = vmatmul.mubr.msk.bf16.vlgmr.msra.gmra.mrb[0].mxu1 %vm313_vm2, %v742_v13  ;;  %v746_v17 = vld [vmem:[%s239_s9 + $0x18] sm:$0xff]  }
  0x14   : > { %693 = vmatmul.mubr.msk.bf16.vlgmr.msra.gmra.mrb[0].mxu0 %vm313_vm2, %v743_v14  ;;  %682 = vmatprep.mubr.msk.bf16.mxu1 %vm313_vm2, %v744_v15  ;;  %v747_v18 = vld [vmem:[%s231_s12 + $0x18] sm:$0xff]  }
  0x15   : > { %696 = vmatprep.mubr.msk.bf16.mxu0 %vm313_vm2, %v745_v16 }
  0x19   : > { %v547_v14 = vld [vmem:[%s858_s20] sm:$0x3] }
  0x1b   : > { %683 = vmatmul.mubr.msk.bf16.gmra.mrb[4].mxu1 %vm313_vm2, %v746_v17 }
  0x1c   : > { %697 = vmatmul.mubr.msk.bf16.gmra.mrb[4].mxu0 %vm313_vm2, %v747_v18 }
  0xe6   : > { %v680_v20 = vpop.f32.mrb[0].mxu1 }
  0xe7   : > { %v694_v21 = vpop.f32.mrb[0].mxu0  ;;  %v367_v22 = vpop.f32.mrb[1].mxu1 }
  0xe8   : > { %v491_v23 = vadd.f32 %v694_v21, %v680_v20  ;;  %v482_v24 = vpop.f32.mrb[1].mxu0  ;;  %v681_v25 = vpop.f32.mrb[2].mxu1 }
  0xe9   : > { %v483_v26 = vadd.f32 %v482_v24, %v367_v22  ;;  %v695_v27 = vpop.f32.mrb[2].mxu0  ;;  %v370_v28 = vpop.f32.mrb[3].mxu1 }
  0xea   : > { %v494_v29 = vadd.f32 %v695_v27, %v681_v25  ;;  %v485_v30 = vpop.f32.mrb[3].mxu0  ;;  %v528_v36 = vmul.f32 %v491_v23, %v491_v23 }
  0xeb   : > { %v486_v31 = vadd.f32 %v485_v30, %v370_v28  ;;  %v526_v32 = vmul.f32 %v483_v26, %v483_v26 }
  0xec   : > { %v529_v44 = vmul.f32 %v494_v29, %v494_v29 }
  0xed   : > { %v513_v33 = vadd.f32 %v486_v31, %v483_v26  ;;  %v527_v34 = vmul.f32 %v486_v31, %v486_v31 }
  0xee   : > { %v684_v35 = vpop.f32.mrb[4].mxu1 }
  0xef   : > { %v514_v37 = vadd.f32 %v513_v33, %v491_v23  ;;  %v534_v38 = vadd.f32 %v527_v34, %v526_v32  ;;  %v698_v39 = vpop.f32.mrb[4].mxu0  ;;  %v383_v40 = vpop.f32.mrb[5].mxu1 }
  0xf0   : > { %v507_v41 = vadd.f32 %v698_v39, %v684_v35  ;;  %v498_v42 = vpop.f32.mrb[5].mxu0  ;;  %v685_v43 = vpop.f32.mrb[6].mxu1 }
  0xf1   : > { %v535_v45 = vadd.f32 %v534_v38, %v528_v36  ;;  %v499_v46 = vadd.f32 %v498_v42, %v383_v40  ;;  %v515_v47 = vadd.f32 %v514_v37, %v494_v29  ;;  %v699_v48 = vpop.f32.mrb[6].mxu0  ;;  %v386_v49 = vpop.f32.mrb[7].mxu1 }
  0xf2   : > { %v510_v50 = vadd.f32 %v699_v48, %v685_v43  ;;  %v501_v51 = vpop.f32.mrb[7].mxu0  ;;  %v532_v59 = vmul.f32 %v507_v41, %v507_v41 }
  0xf3   : > { %v516_v52 = vadd.f32 %v515_v47, %v499_v46  ;;  %v530_v53 = vmul.f32 %v499_v46, %v499_v46  ;;  %v536_v54 = vadd.f32 %v535_v45, %v529_v44  ;;  %v502_v55 = vadd.f32 %v501_v51, %v386_v49 }
  0xf4   : > { %v533_v62 = vmul.f32 %v510_v50, %v510_v50 }
  0xf5   : > { %v537_v56 = vadd.f32 %v536_v54, %v530_v53  ;;  %v517_v57 = vadd.f32 %v516_v52, %v502_v55  ;;  %v531_v58 = vmul.f32 %v502_v55, %v502_v55 }
  0xf7   : > { %v518_v60 = vadd.f32 %v517_v57, %v507_v41  ;;  %v538_v61 = vadd.f32 %v537_v56, %v531_v58 }
  0xf9   : > { %v519_v63 = vadd.f32 %v518_v60, %v510_v50  ;;  %v539_v0 = vadd.f32 %v538_v61, %v532_v59 }
  0xfb   : > { %v520_v1 = vrot.slane %v519_v63, 4  ;;  %v540_v2 = vadd.f32 %v539_v0, %v533_v62 }
  0xfd   : > { %v521_v3 = vadd.f32 %v520_v1, %v519_v63  ;;  %v541_v4 = vrot.slane %v540_v2, 4 }
  0xff   : > { %v522_v5 = vrot.slane %v521_v3, 2  ;;  %v542_v6 = vadd.f32 %v541_v4, %v540_v2 }
 0x101   : > { %v523_v7 = vadd.f32 %v522_v5, %v521_v3  ;;  %v543_v8 = vrot.slane %v542_v6, 2 }
 0x103   : > { %v524_v9 = vrot.slane %v523_v7, 1  ;;  %v544_v10 = vadd.f32 %v543_v8, %v542_v6 }
 0x105   : > { %v545_v11 = vrot.slane %v544_v10, 1  ;;  %v525_v12 = vadd.f32 %v524_v9, %v523_v7 }
 0x107   : > { %v546_v13 = vadd.f32 %v545_v11, %v544_v10 }
 0x109   : > { %v548_v15 = vsel %vm326_vm0, %v525_v12, %v546_v13 }
 0x10a   : > { %v549_v16 = vadd.f32 %v548_v15, %v547_v14 }
 0x10c   : > { %550 = vst [vmem:[%s858_s20] sm:$0x3] %v549_v16 }
 0x10d PF: > { %s14_s17 = sadd.s32 1, %s770_s17   ;;  %s878_s15 = smov %s766_s16 }
 0x10e   : > { %p11_p6 = scmp.ge.s32.totalorder %s14_s17, 4   ;;  %s879_s16 = smov %s881_s18 }
 0x110   :  { %13 = sbr.rel (!%p11_p6) target bundleno = 2 (0x2), region = 73 }

// kernel: encoder_forward.3
= control target key start
LH: loop header
LB: loop body
LE: loop exit
PB: predicated region body
PF: predicated region fallthrough
CT: control target
= control target key end

     0   :  { %s858_s18 = smov 0   ;;  %s922_s0 = inlined_call_operand.vmem [shape: bf16[128,35], index: 0, kind: input, shape index: {}]   ;;  %s923_s1 = inlined_call_operand.vmem [shape: bf16[128,35], index: 1, kind: input, shape index: {}]   ;;  %s924_s2 = inlined_call_operand.vmem [shape: bf16[35,128], index: 2, kind: input, shape index: {}]   ;;  %s925_s3 = inlined_call_operand.vmem [shape: bf16[35,128], index: 3, kind: input, shape index: {}]   ;;  %s926_s4 = inlined_call_operand.vmem [shape: f32[2,128], index: 4, kind: input, shape index: {}]   ;;  %s927_s5 = inlined_call_operand.vmem [shape: bf16[128,128], index: 5, kind: output, shape index: {}]  }
   0x1 LB: > { %s670_s19 = sadd.s32 4294967295, %s825_s18   ;;  %p674_p0 = scmp.ge.s32.totalorder %s825_s18, 1  ;;  %s825_s18 = sphi %s858_s18, %s15_s18  }
   0x2   : > { %p199_p1 = scmp.lt.s32.totalorder %s825_s18, 3 }
   0x4   : > { %p200_p2 = pnand %p674_p0, %p199_p1 }
   0x5   : > { %v805_v0 = vld [vmem:[%s925_s3] sm:$0xff] (!%p200_p2)   ;;  %vm325_vm0 = vcmask (!%p200_p2), 1040384   ;;  %vm326_vm1 = vcmask (!%p200_p2), 1041408   ;;  %v807_v2 = vld [vmem:[%s925_s3 + $0x8] sm:$0xff] (!%p200_p2)   ;;  %v827_v4 = vmov (!%p200_p2), 65535   ;;  %s675_s7 = sshll.u32 (!%p200_p2), %s670_s19, 3 }
   0x6   : > { %203 = sbr.rel (%p200_p2) target bundleno = 254 (0xfe), region = 40  ;;  %v806_v1 = vld [vmem:[%s924_s2] sm:$0xff] (!%p200_p2)   ;;  %760 = vmatprep.subr.bf16.mxu1 (!%p200_p2), %v805_v0  ;;  %v808_v3 = vld [vmem:[%s924_s2 + $0x8] sm:$0xff] (!%p200_p2)   ;;  %v327_v5 = vsel (!%p200_p2), %vm325_vm0, 4294967295, %v827_v4  ;;  %p233_p3 = scmp.lt.s32.totalorder (!%p200_p2), %s675_s7, 15  ;;  %vm312_vm2 = vcmask (!%p200_p2), 285696  }
   0x7   : > { %774 = vmatprep.subr.bf16.mxu0 (!%p200_p2), %v806_v1  ;;  %761 = vmatpush3.bf16.msra.mxu1 (!%p200_p2), %v805_v0  ;;  %v809_v6 = vld [vmem:[%s925_s3 + $0x10] ss:$0 sps:$4 sm:$0x33] (!%p200_p2)   ;;  %v328_v7 = vsel (!%p200_p2), %vm326_vm1, %v327_v5, 0  ;;  %v703_v21 = vld [vmem:[%s926_s4] ss:$0 sm:$0xff] (!%p200_p2) }
   0x8   : > { %775 = vmatpush3.bf16.msra.mxu0 (!%p200_p2), %v806_v1  ;;  %762 = vmatprep.subr.bf16.mxu1 (!%p200_p2), %v807_v2  ;;  %v810_v8 = vld [vmem:[%s924_s2 + $0x10] ss:$0 sps:$4 sm:$0x33] (!%p200_p2)   ;;  %v330_v9 = vand.u32 (!%p200_p2), %v809_v6, %v328_v7  ;;  %v704_v26 = vld [vmem:[%s926_s4 + $0x1] ss:$0 sm:$0xff] (!%p200_p2) }
   0x9   : > { %776 = vmatprep.subr.bf16.mxu0 (!%p200_p2), %v808_v3  ;;  %v445_v10 = vand.u32 (!%p200_p2), %v810_v8, %v328_v7 }
   0xb   : > { %763 = vmatpush3.bf16.msra.mxu1 (!%p200_p2), %v807_v2 }
   0xc   : > { %777 = vmatpush3.bf16.msra.mxu0 (!%p200_p2), %v808_v3  ;;  %764 = vmatprep.subr.bf16.mxu1 (!%p200_p2), %v330_v9 }
   0xd   : > { %s929_s7 = smov (!%p233_p3, %s675_s7), 15  ;;  %778 = vmatprep.subr.bf16.mxu0 %v445_v10 }
   0xe   : > { %s884_s8 = sshll.u32 %s929_s7, 2 }
   0xf   : > { %765 = vmatpush3.bf16.msra.mxu1 %v330_v9  ;;  %s242_s11 = scalar_lea.vmem %s923_s1, %s884_s8  ;;  %s236_s14 = scalar_lea.vmem %s922_s0, %s884_s8 }
  0x10   : > { %779 = vmatpush3.bf16.msra.mxu0 %v445_v10  ;;  %v811_v11 = vld [vmem:[%s242_s11] sm:$0xff]   ;;  %v813_v13 = vld [vmem:[%s242_s11 + $0x8] sm:$0xff]   ;;  %v815_v15 = vld [vmem:[%s242_s11 + $0x10] sm:$0xff]   ;;  %s913_s22 = scalar_lea.vmem %s927_s5, %s884_s8 }
  0x11   : > { %v812_v12 = vld [vmem:[%s236_s14] sm:$0xff]   ;;  %766 = vmatprep.mubr.msk.bf16.mxu1 %vm312_vm2, %v811_v11  ;;  %v814_v14 = vld [vmem:[%s236_s14 + $0x8] sm:$0xff]   ;;  %v816_v16 = vld [vmem:[%s236_s14 + $0x10] sm:$0xff]  }
  0x12   : > { %780 = vmatprep.mubr.msk.bf16.mxu0 %vm312_vm2, %v812_v12  ;;  %767 = vmatmul.mubr.msk.bf16.vlgmr.msra.gmra.mrb[0].mxu1 %vm312_vm2, %v813_v13  ;;  %v817_v17 = vld [vmem:[%s242_s11 + $0x18] sm:$0xff]  }
  0x13   : > { %781 = vmatmul.mubr.msk.bf16.vlgmr.msra.gmra.mrb[0].mxu0 %vm312_vm2, %v814_v14  ;;  %770 = vmatprep.mubr.msk.bf16.mxu1 %vm312_vm2, %v815_v15  ;;  %v818_v18 = vld [vmem:[%s236_s14 + $0x18] sm:$0xff]  }
  0x14   : > { %784 = vmatprep.mubr.msk.bf16.mxu0 %vm312_vm2, %v816_v16 }
  0x1a   : > { %771 = vmatmul.mubr.msk.bf16.gmra.mrb[4].mxu1 %vm312_vm2, %v817_v17 }
  0x1b   : > { %785 = vmatmul.mubr.msk.bf16.gmra.mrb[4].mxu0 %vm312_vm2, %v818_v18 }
  0xe5   : > { %v768_v19 = vpop.f32.mrb[0].mxu1 }
  0xe6   : > { %v782_v20 = vpop.f32.mrb[0].mxu0  ;;  %v366_v22 = vpop.f32.mrb[1].mxu1 }
  0xe7   : > { %v490_v23 = vadd.f32 %v782_v20, %v768_v19  ;;  %v481_v24 = vpop.f32.mrb[1].mxu0  ;;  %v769_v25 = vpop.f32.mrb[2].mxu1 }
  0xe8   : > { %v482_v27 = vadd.f32 %v481_v24, %v366_v22  ;;  %v783_v28 = vpop.f32.mrb[2].mxu0  ;;  %v369_v29 = vpop.f32.mrb[3].mxu1 }
  0xe9   : > { %v519_v30 = vmul.f32 %v703_v21, %v490_v23  ;;  %v493_v31 = vadd.f32 %v783_v28, %v769_v25  ;;  %v484_v32 = vpop.f32.mrb[3].mxu0 }
  0xea   : > { %v517_v33 = vmul.f32 %v703_v21, %v482_v27  ;;  %v485_v34 = vadd.f32 %v484_v32, %v369_v29 }
  0xeb   : > { %v532_v35 = vadd.f32 %v704_v26, %v519_v30  ;;  %v520_v36 = vmul.f32 %v703_v21, %v493_v31 }
  0xec   : > { %v530_v37 = vadd.f32 %v704_v26, %v517_v33  ;;  %v518_v38 = vmul.f32 %v703_v21, %v485_v34 }
  0xed   : > { %vm540_vm3 = vcmp.ge.f32.partialorder %v532_v35, 0.0  ;;  %v548_v39 = vmul.f32 0.01, %v532_v35  ;;  %v533_v40 = vadd.f32 %v704_v26, %v520_v36  ;;  %v772_v41 = vpop.f32.mrb[4].mxu1 }
  0xee   : > { %vm538_vm4 = vcmp.ge.f32.partialorder %v530_v37, 0.0  ;;  %v546_v42 = vmul.f32 0.01, %v530_v37  ;;  %v531_v43 = vadd.f32 %v704_v26, %v518_v38  ;;  %v786_v44 = vpop.f32.mrb[4].mxu0  ;;  %v382_v45 = vpop.f32.mrb[5].mxu1 }
  0xef   : > { %vm541_vm5 = vcmp.ge.f32.partialorder %v533_v40, 0.0  ;;  %v549_v46 = vmul.f32 0.01, %v533_v40  ;;  %v506_v47 = vadd.f32 %v786_v44, %v772_v41  ;;  %v497_v48 = vpop.f32.mrb[5].mxu0  ;;  %v773_v49 = vpop.f32.mrb[6].mxu1  ;;  %v556_v50 = vsel %vm540_vm3, %v532_v35, %v548_v39 }
  0xf0   : > { %vm539_vm6 = vcmp.ge.f32.partialorder %v531_v43, 0.0  ;;  %v547_v51 = vmul.f32 0.01, %v531_v43  ;;  %v498_v52 = vadd.f32 %v497_v48, %v382_v45  ;;  %v787_v53 = vpop.f32.mrb[6].mxu0  ;;  %v385_v54 = vpop.f32.mrb[7].mxu1  ;;  %v554_v55 = vsel %vm538_vm4, %v530_v37, %v546_v42 }
  0xf1   : > { %v557_v56 = vsel %vm541_vm5, %v533_v40, %v549_v46  ;;  %v523_v57 = vmul.f32 %v703_v21, %v506_v47  ;;  %v509_v58 = vadd.f32 %v787_v53, %v773_v49  ;;  %v500_v59 = vpop.f32.mrb[7].mxu0 }
  0xf2   : > { %v731_v60 = vpack.c.bf16 %v557_v56, %v556_v50  ;;  %v555_v61 = vsel %vm539_vm6, %v531_v43, %v547_v51  ;;  %v521_v62 = vmul.f32 %v703_v21, %v498_v52  ;;  %v501_v63 = vadd.f32 %v500_v59, %v385_v54 }
  0xf3   : > { %v726_v0 = vpack.c.bf16 %v555_v61, %v554_v55  ;;  %v536_v1 = vadd.f32 %v704_v26, %v523_v57  ;;  %v524_v2 = vmul.f32 %v703_v21, %v509_v58 }
  0xf4   : > { %743 = vst [vmem:[%s913_s22 + $0x8] sm:$0xff] %v731_v60   ;;  %v534_v3 = vadd.f32 %v704_v26, %v521_v62  ;;  %v522_v4 = vmul.f32 %v703_v21, %v501_v63 }
  0xf5   : > { %727 = vst [vmem:[%s913_s22] sm:$0xff] %v726_v0   ;;  %v552_v5 = vmul.f32 0.01, %v536_v1  ;;  %v537_v6 = vadd.f32 %v704_v26, %v524_v2  ;;  %vm544_vm7 = vcmp.ge.f32.partialorder %v536_v1, 0.0 }
  0xf6   : > { %v550_v7 = vmul.f32 0.01, %v534_v3  ;;  %v535_v8 = vadd.f32 %v704_v26, %v522_v4  ;;  %vm542_vm8 = vcmp.ge.f32.partialorder %v534_v3, 0.0 }
  0xf7   : > { %vm545_vm9 = vcmp.ge.f32.partialorder %v537_v6, 0.0  ;;  %v553_v9 = vmul.f32 0.01, %v537_v6  ;;  %v560_v11 = vsel %vm544_vm7, %v536_v1, %v552_v5 }
  0xf8   : > { %vm543_vm10 = vcmp.ge.f32.partialorder %v535_v8, 0.0  ;;  %v551_v10 = vmul.f32 0.01, %v535_v8  ;;  %v558_v13 = vsel %vm542_vm8, %v534_v3, %v550_v7 }
  0xf9   : > { %v561_v12 = vsel %vm545_vm9, %v537_v6, %v553_v9 }
  0xfa   : > { %v741_v14 = vpack.c.bf16 %v561_v12, %v560_v11  ;;  %v559_v15 = vsel %vm543_vm10, %v535_v8, %v551_v10 }
  0xfb   : > { %v736_v16 = vpack.c.bf16 %v559_v15, %v558_v13 }
  0xfc   : > { %745 = vst [vmem:[%s913_s22 + $0x18] sm:$0xff] %v741_v14  }
  0xfd   : > { %744 = vst [vmem:[%s913_s22 + $0x10] sm:$0xff] %v736_v16  }
  0xfe PF: > { %s15_s18 = sadd.s32 1, %s825_s18  }
  0xff   : > { %p12_p4 = scmp.ge.s32.totalorder %s15_s18, 4  }
 0x101   :  { %14 = sbr.rel (!%p12_p4) target bundleno = 1 (0x1), region = 73 }

</bundles_post_ra>
